<compile_context>
chip_gen: v6e
topology: v6e:2x2x1
jax: 0.10.0
libtpu: 0.0.40
codegen_flags: <defaults>
</compile_context>

<pallas_src>
import jax
import jax.numpy as jnp
from jax.experimental import pallas as pl
from jax.experimental.pallas import tpu as pltpu


_TILE = 4096          # max pixel (lane) tile; multiple of 128
_MAX_F_CHUNK = 512    # faces per one-hot / DMA chunk; multiple of 128


def _round_up(x, m):
    return (x + m - 1) // m * m


def _cdiv(a, b):
    return (a + b - 1) // b


def _simple_shader_kernel(lo_ref, hi_ref, p2f_ref, bary_ref, colors_hbm, bg_ref,
                          out_ref, cbuf_ref, sem_ref):
    # lo_ref/hi_ref: (N*num_tiles,) int32 SMEM   first/last face chunk per tile
    # p2f_ref:       (1, 1, T)  int32   top-face id per pixel (-1 => background)
    # bary_ref:      (1, 3, T)  float32 top-face barycentric coords
    # colors_hbm:    (num_chunks, 16, f_chunk) bf16 in HBM; rows 0..8 hold
    #                v0.rgb v1.rgb v2.rgb, rows 9..15 are zero padding
    # bg_ref:        (3, 1)     float32 background color
    # out_ref:       (1, 4, T)  bf16    RGBA, channels on sublanes, pixels on lanes
    # cbuf_ref:      (2, 16, f_chunk) bf16 VMEM scratch (double buffer)
    # sem_ref:       (2,) DMA semaphores
    num_chunks, _, f_chunk = colors_hbm.shape

    flat = pl.program_id(0) * pl.num_programs(1) + pl.program_id(1)
    lo = lo_ref[flat]
    hi = hi_ref[flat]

    idx = p2f_ref[0]                                     # (1, T) int32
    tile = idx.shape[-1]
    is_bg = idx < 0                                      # (1, T) bool
    bg_b = jnp.broadcast_to(bg_ref[...], (3, tile))      # (3, T) f32, hoisted once

    @pl.when(hi < lo)
    def _pure_background():                              # no foreground pixel here
        out_ref[0, 0:3, :] = bg_b.astype(out_ref.dtype)
        out_ref[0, 3:4, :] = jnp.zeros((1, tile), out_ref.dtype)

    @pl.when(hi >= lo)
    def _shade():
        # Hoisted iota: (Fc, 1), compared against idx (1, T) via broadcasting.
        face_iota = jax.lax.broadcasted_iota(jnp.int32, (f_chunk, 1), 0)

        def start_copy(c, slot):
            pltpu.make_async_copy(colors_hbm.at[c], cbuf_ref.at[slot],
                                  sem_ref.at[slot]).start()

        def wait_copy(slot):
            pltpu.make_async_copy(colors_hbm.at[0], cbuf_ref.at[slot],
                                  sem_ref.at[slot]).wait()

        def gather_chunk(c, cols):
            # One-hot in bf16 (0/1 exact); MXU bf16 matmul, f32 accumulate.
            onehot = (face_iota + c * f_chunk == idx).astype(jnp.bfloat16)  # (Fc,T)
            return jnp.dot(cols, onehot,
                           preferred_element_type=jnp.float32)              # (16,T)

        if num_chunks == 1:
            # Static single-chunk path (fully visible to the LLO scheduler).
            start_copy(0, 0)
            wait_copy(0)
            g = gather_chunk(0, cbuf_ref[0])
        else:
            start_copy(lo, 0)

            def body(c, g_acc):
                slot = (c - lo) & 1
                wait_copy(slot)

                @pl.when(c + 1 <= hi)
                def _():                                 # prefetch next touched chunk
                    start_copy(c + 1, 1 - slot)

                return g_acc + gather_chunk(c, cbuf_ref[slot])

            g = jax.lax.fori_loop(lo, hi + 1, body,
                                  jnp.zeros((16, tile), jnp.float32))

        # Barycentric interpolation, lane-dense: texel[c] = sum_j bary[j] * v_j[c].
        bary = bary_ref[0]                               # (3, T) f32
        texel = (bary[0:1] * g[0:3]
                 + bary[1:2] * g[3:6]
                 + bary[2:3] * g[6:9])                   # (3, T) f32

        # hard_rgb_blend: background where no face, alpha = foreground mask.
        out_ref[0, 0:3, :] = jnp.where(is_bg, bg_b, texel).astype(out_ref.dtype)
        out_ref[0, 3:4, :] = jnp.where(is_bg, 0.0, 1.0).astype(out_ref.dtype)


def simple_shader_forward(pix_to_face, bary_coords, face_vertex_colors,
                          background_color):
    """Pallas implementation of SimpleShader.forward (TexturesVertex + hard_rgb_blend).

    pix_to_face:        (N, H, W, K) int32   rasterized face ids (-1 = none)
    bary_coords:        (N, H, W, K, 3) float32
    face_vertex_colors: (F, 3, 3) float32    per-face, per-vertex RGB
    background_color:   (3,) float32
    returns:            (N, H, W, 4) float32 RGBA image
    """
    N, H, W, K = pix_to_face.shape
    F = face_vertex_colors.shape[0]
    HW = H * W

    # --- wrapper-side prep (cheap, fused XLA ops) ----------------------------
    # Only the K=0 face contributes to hard_rgb_blend -> pre-slice fragments.
    p2f_top = pix_to_face[..., 0].reshape(N, 1, HW).astype(jnp.int32)        # (N,1,HW)
    bary_top = bary_coords[..., 0, :].reshape(N, HW, 3).astype(jnp.float32)
    bary_top = jnp.transpose(bary_top, (0, 2, 1))                            # (N,3,HW)

    # Balanced lane-dense pixel tiles (multiple of 128, <= _TILE).
    tile = _round_up(_cdiv(HW, _cdiv(HW, _TILE)), 128)
    num_tiles = _cdiv(HW, tile)
    hw_pad = num_tiles * tile
    if hw_pad != HW:
        p2f_top = jnp.pad(p2f_top, ((0, 0), (0, 0), (0, hw_pad - HW)),
                          constant_values=-1)             # padding == background
        bary_top = jnp.pad(bary_top, ((0, 0), (0, 0), (0, hw_pad - HW)))

    # Face colors as (num_chunks, 16, f_chunk) bf16 (rows 9..15 zero) so one chunk
    # is a clean (16, f_chunk) slab for the manual DMA and the MXU gather.
    f_chunk = min(_MAX_F_CHUNK, _round_up(F, 128))
    f_pad = _round_up(F, f_chunk)
    num_chunks = f_pad // f_chunk
    colors_t = face_vertex_colors.reshape(F, 9).T.astype(jnp.bfloat16)       # (9, F)
    colors_t = jnp.pad(colors_t, ((0, 7), (0, f_pad - F)))                   # (16,Fp)
    colors_c = colors_t.reshape(16, num_chunks, f_chunk).transpose(1, 0, 2)

    # Per-(image, tile) face-chunk range, scalar-prefetched to SMEM. The kernel
    # only touches chunks [lo, hi]; hi < lo marks a pure-background tile.
    p2f_tiles = p2f_top.reshape(N, num_tiles, tile)
    fg = p2f_tiles >= 0
    cid = p2f_tiles // f_chunk
    chunk_lo = jnp.min(jnp.where(fg, cid, num_chunks), axis=-1)
    chunk_hi = jnp.max(jnp.where(fg, cid, -1), axis=-1)
    chunk_lo = chunk_lo.reshape(-1).astype(jnp.int32)
    chunk_hi = chunk_hi.reshape(-1).astype(jnp.int32)

    bg = background_color.reshape(3, 1).astype(jnp.float32)

    out = pl.pallas_call(
        _simple_shader_kernel,
        out_shape=jax.ShapeDtypeStruct((N, 4, hw_pad), jnp.bfloat16),
        grid_spec=pltpu.PrefetchScalarGridSpec(
            num_scalar_prefetch=2,
            grid=(N, num_tiles),
            in_specs=[
                pl.BlockSpec((1, 1, tile), lambda n, t, lo, hi: (n, 0, t)),
                pl.BlockSpec((1, 3, tile), lambda n, t, lo, hi: (n, 0, t)),
                pl.BlockSpec(memory_space=pl.ANY),        # colors stay in HBM
                pl.BlockSpec((3, 1), lambda n, t, lo, hi: (0, 0)),
            ],
            out_specs=pl.BlockSpec((1, 4, tile), lambda n, t, lo, hi: (n, 0, t)),
            scratch_shapes=[
                pltpu.VMEM((2, 16, f_chunk), jnp.bfloat16),   # colors double-buffer
                pltpu.SemaphoreType.DMA((2,)),
            ],
        ),
        compiler_params=pltpu.CompilerParams(
            dimension_semantics=("parallel", "parallel"),
            vmem_limit_bytes=32 * 1024 * 1024),
    )(chunk_lo, chunk_hi, p2f_top, bary_top, colors_c, bg)

    out = out[:, :, :HW]                                   # drop lane padding
    # Channels-last float32 for consumers; reading bf16 halves this pass's input
    # traffic vs an f32 kernel output.
    return jnp.transpose(out, (0, 2, 1)).astype(jnp.float32).reshape(N, H, W, 4)


def _reference_forward(pix_to_face, bary_coords, face_vertex_colors,
                       background_color):
    """Plain-JAX reference mirroring PyTorch3D sample_textures + hard_rgb_blend."""
    idx = pix_to_face[..., 0]                                   # (N,H,W)
    is_bg = idx < 0
    idx_c = jnp.where(is_bg, 0, idx)
    gathered = face_vertex_colors[idx_c]                        # (N,H,W,3,3)
    b = bary_coords[..., 0, :]                                  # (N,H,W,3)
    texel = jnp.sum(b[..., :, None] * gathered, axis=-2)        # (N,H,W,3)
    rgb = jnp.where(is_bg[..., None], background_color, texel)
    alpha = (~is_bg).astype(jnp.float32)[..., None]
    return jnp.concatenate([rgb, alpha], axis=-1)


def _run_case(key, N, H, W, K, F, bg_rows=0):
    k1, k2, k3 = jax.random.split(key, 3)
    # Synthetic "fragments": pix_to_face in [-1, F); -1 marks background pixels.
    pix_to_face = jax.random.randint(k1, (N, H, W, K), -1, F, dtype=jnp.int32)
    if bg_rows:
        pix_to_face = pix_to_face.at[:, :bg_rows].set(-1)   # force pure-bg tiles
    bary_raw = jax.random.uniform(k2, (N, H, W, K, 3), dtype=jnp.float32) + 1e-3
    bary_coords = bary_raw / jnp.sum(bary_raw, axis=-1, keepdims=True)
    face_vertex_colors = jax.random.uniform(k3, (F, 3, 3), dtype=jnp.float32)
    background_color = jnp.array([1.0, 1.0, 1.0], dtype=jnp.float32)

    images = simple_shader_forward(pix_to_face, bary_coords,
                                   face_vertex_colors, background_color)
    images = jax.block_until_ready(images)

    ref = _reference_forward(pix_to_face, bary_coords, face_vertex_colors,
                             background_color)
    assert images.shape == (N, H, W, 4)
    # bf16 colors + bf16 kernel output -> <= ~0.4% rounding vs the f32 reference.
    err = float(jnp.max(jnp.abs(images - ref)))
    assert jnp.allclose(images, ref, atol=1e-2, rtol=1e-2), err
    return images


if __name__ == "__main__":
    key = jax.random.PRNGKey(0)
    k_a, k_b = jax.random.split(key)
    # Small case: single face chunk, single pixel tile.
    _run_case(k_a, N=2, H=16, W=16, K=4, F=8)
    # Larger case: multi-chunk face loop (double-buffered DMA), lane padding,
    # multi-tile grid and a pure-background tile (fast path).
    _run_case(k_b, N=1, H=72, W=72, K=2, F=700, bg_rows=41)
    print("KERNEL_OK")
</pallas_src>

<mosaic_0001>
module attributes {stable_mosaic.version = 11 : i64} {
  func.func @_simple_shader_kernel(%arg0: i32, %arg1: i32, %arg2: memref<2xi32, #tpu.memory_space<smem>>, %arg3: memref<2xi32, #tpu.memory_space<smem>>, %arg4: memref<1x1x256xi32, #tpu.memory_space<vmem>>, %arg5: memref<1x3x256xf32, #tpu.memory_space<vmem>>, %arg6: memref<1x16x128xbf16, #tpu.memory_space<any>>, %arg7: memref<3x1xf32, #tpu.memory_space<vmem>>, %arg8: memref<1x4x256xbf16, #tpu.memory_space<vmem>>, %arg9: memref<2x16x128xbf16, #tpu.memory_space<vmem>>, %arg10: memref<2x!tpu.dma_semaphore, #tpu.memory_space<semaphore_mem>>) attributes {dimension_semantics = [#tpu.dimension_semantics<parallel>, #tpu.dimension_semantics<parallel>], iteration_bounds = array<i64: 2, 1>, scalar_prefetch = 2 : i64, scratch_operands = 2 : i64, tpu.core_type = #tpu.core_type<tc>, window_params = [{transform_indices = @transform_0, window_bounds = array<i64: 1, 1, 256>}, {transform_indices = @transform_1, window_bounds = array<i64: 1, 3, 256>}, {}, {pipeline_mode = #tpu.pipeline_mode<synchronous>, transform_indices = @transform_3, window_bounds = array<i64: 3, 1>}, {transform_indices = @transform_4, window_bounds = array<i64: 1, 4, 256>}]} {
    %c1_i32 = arith.constant 1 : i32
    %0 = arith.muli %arg0, %c1_i32 : i32
    %1 = arith.addi %0, %arg1 : i32
    %2 = arith.index_cast %1 : i32 to index
    %3 = memref.load %arg2[%2] : memref<2xi32, #tpu.memory_space<smem>>
    %4 = arith.index_cast %1 : i32 to index
    %5 = memref.load %arg3[%4] : memref<2xi32, #tpu.memory_space<smem>>
    %c0 = arith.constant 0 : index
    %c0_0 = arith.constant 0 : index
    %c0_1 = arith.constant 0 : index
    %6 = vector.load %arg4[%c0, %c0_0, %c0_1] : memref<1x1x256xi32, #tpu.memory_space<vmem>>, vector<1x1x256xi32>
    %7 = vector.shape_cast %6 : vector<1x1x256xi32> to vector<1x256xi32>
    %c0_i32 = arith.constant 0 : i32
    %8 = vector.broadcast %c0_i32 : i32 to vector<1x256xi32>
    %9 = arith.cmpi slt, %7, %8 : vector<1x256xi32>
    %c0_2 = arith.constant 0 : index
    %c0_3 = arith.constant 0 : index
    %10 = vector.load %arg7[%c0_2, %c0_3] : memref<3x1xf32, #tpu.memory_space<vmem>>, vector<3x1xf32>
    %11 = vector.shape_cast %10 : vector<3x1xf32> to vector<3x1xf32>
    %12 = vector.broadcast %11 : vector<3x1xf32> to vector<3x256xf32>
    %13 = arith.cmpi slt, %5, %3 : i32
    %14 = arith.extui %13 : i1 to i32
    %c0_i32_4 = arith.constant 0 : i32
    %15 = arith.cmpi ne, %14, %c0_i32_4 : i32
    scf.if %15 {
      %19 = arith.truncf %12 : vector<3x256xf32> to vector<3x256xbf16>
      %c0_6 = arith.constant 0 : index
      %c0_7 = arith.constant 0 : index
      %c0_8 = arith.constant 0 : index
      %20 = vector.load %arg8[%c0_6, %c0_7, %c0_8] : memref<1x4x256xbf16, #tpu.memory_space<vmem>>, vector<1x3x256xbf16>
      %21 = vector.shape_cast %20 : vector<1x3x256xbf16> to vector<3x256xbf16>
      %22 = vector.shape_cast %19 : vector<3x256xbf16> to vector<1x3x256xbf16>
      tpu.vector_store %arg8[%c0_6, %c0_7, %c0_8], %22 {strides = array<i32>} : memref<1x4x256xbf16, #tpu.memory_space<vmem>>, vector<1x3x256xbf16>,
      %cst = arith.constant 0.000000e+00 : bf16
      %23 = vector.broadcast %cst : bf16 to vector<1x256xbf16>
      %c0_9 = arith.constant 0 : index
      %c3 = arith.constant 3 : index
      %c0_10 = arith.constant 0 : index
      %24 = vector.load %arg8[%c0_9, %c3, %c0_10] : memref<1x4x256xbf16, #tpu.memory_space<vmem>>, vector<1x1x256xbf16>
      %25 = vector.shape_cast %24 : vector<1x1x256xbf16> to vector<1x256xbf16>
      %26 = vector.shape_cast %23 : vector<1x256xbf16> to vector<1x1x256xbf16>
      tpu.vector_store %arg8[%c0_9, %c3, %c0_10], %26 {strides = array<i32>} : memref<1x4x256xbf16, #tpu.memory_space<vmem>>, vector<1x1x256xbf16>,
    } else {
    }
    %16 = arith.cmpi sge, %5, %3 : i32
    %17 = arith.extui %16 : i1 to i32
    %c0_i32_5 = arith.constant 0 : i32
    %18 = arith.cmpi ne, %17, %c0_i32_5 : i32
    scf.if %18 {
      %19 = tpu.iota {dimensions = array<i32: 0>} : vector<128x1xi32>
      %c0_i32_6 = arith.constant 0 : i32
      %c0_i32_7 = arith.constant 0 : i32
      %c0_i32_8 = arith.constant 0 : i32
      %c0_i32_9 = arith.constant 0 : i32
      %c0_i32_10 = arith.constant 0 : i32
      %20 = tpu.memref_slice %arg6[%c0_i32_6, %c0_i32_9, %c0_i32_10] : memref<1x16x128xbf16, #tpu.memory_space<any>> -> memref<1x16x128xbf16, #tpu.memory_space<any>>
      %21 = tpu.memref_squeeze %20 : memref<1x16x128xbf16, #tpu.memory_space<any>> -> memref<16x128xbf16, #tpu.memory_space<any>>
      %c0_i32_11 = arith.constant 0 : i32
      %c0_i32_12 = arith.constant 0 : i32
      %22 = tpu.memref_slice %arg9[%c0_i32_7, %c0_i32_11, %c0_i32_12] : memref<2x16x128xbf16, #tpu.memory_space<vmem>> -> memref<1x16x128xbf16, #tpu.memory_space<vmem>>
      %23 = tpu.memref_squeeze %22 : memref<1x16x128xbf16, #tpu.memory_space<vmem>> -> memref<16x128xbf16, #tpu.memory_space<vmem>>
      %24 = tpu.memref_slice %arg10[%c0_i32_8] : memref<2x!tpu.dma_semaphore, #tpu.memory_space<semaphore_mem>> -> memref<1x!tpu.dma_semaphore, #tpu.memory_space<semaphore_mem>>
      %25 = tpu.memref_squeeze %24 : memref<1x!tpu.dma_semaphore, #tpu.memory_space<semaphore_mem>> -> memref<!tpu.dma_semaphore, #tpu.memory_space<semaphore_mem>>
      tpu.enqueue_dma source(%21 : memref<16x128xbf16, #tpu.memory_space<any>>) target(%23 : memref<16x128xbf16, #tpu.memory_space<vmem>>) target_semaphore(%25 : memref<!tpu.dma_semaphore, #tpu.memory_space<semaphore_mem>>)
      %c0_i32_13 = arith.constant 0 : i32
      %c0_i32_14 = arith.constant 0 : i32
      %c0_i32_15 = arith.constant 0 : i32
      %c0_i32_16 = arith.constant 0 : i32
      %c0_i32_17 = arith.constant 0 : i32
      %26 = tpu.memref_slice %arg6[%c0_i32_13, %c0_i32_16, %c0_i32_17] : memref<1x16x128xbf16, #tpu.memory_space<any>> -> memref<1x16x128xbf16, #tpu.memory_space<any>>
      %27 = tpu.memref_squeeze %26 : memref<1x16x128xbf16, #tpu.memory_space<any>> -> memref<16x128xbf16, #tpu.memory_space<any>>
      %c0_i32_18 = arith.constant 0 : i32
      %c0_i32_19 = arith.constant 0 : i32
      %28 = tpu.memref_slice %arg9[%c0_i32_14, %c0_i32_18, %c0_i32_19] : memref<2x16x128xbf16, #tpu.memory_space<vmem>> -> memref<1x16x128xbf16, #tpu.memory_space<vmem>>
      %29 = tpu.memref_squeeze %28 : memref<1x16x128xbf16, #tpu.memory_space<vmem>> -> memref<16x128xbf16, #tpu.memory_space<vmem>>
      %30 = tpu.memref_slice %arg10[%c0_i32_15] : memref<2x!tpu.dma_semaphore, #tpu.memory_space<semaphore_mem>> -> memref<1x!tpu.dma_semaphore, #tpu.memory_space<semaphore_mem>>
      %31 = tpu.memref_squeeze %30 : memref<1x!tpu.dma_semaphore, #tpu.memory_space<semaphore_mem>> -> memref<!tpu.dma_semaphore, #tpu.memory_space<semaphore_mem>>
      tpu.wait_dma2 semaphore(%31 : memref<!tpu.dma_semaphore, #tpu.memory_space<semaphore_mem>>) src(%27 : memref<16x128xbf16, #tpu.memory_space<any>>) dst(%29 : memref<16x128xbf16, #tpu.memory_space<vmem>>)
      %c0_20 = arith.constant 0 : index
      %c0_21 = arith.constant 0 : index
      %c0_22 = arith.constant 0 : index
      %32 = vector.load %arg9[%c0_20, %c0_21, %c0_22] : memref<2x16x128xbf16, #tpu.memory_space<vmem>>, vector<1x16x128xbf16>
      %33 = vector.shape_cast %32 : vector<1x16x128xbf16> to vector<16x128xbf16>
      %c0_i32_23 = arith.constant 0 : i32
      %34 = vector.broadcast %c0_i32_23 : i32 to vector<128x1xi32>
      %35 = arith.addi %19, %34 : vector<128x1xi32>
      %36 = vector.broadcast %35 : vector<128x1xi32> to vector<128x256xi32>
      %37 = vector.broadcast %7 : vector<1x256xi32> to vector<128x256xi32>
      %38 = arith.cmpi eq, %36, %37 : vector<128x256xi32>
      %39 = arith.extui %38 : vector<128x256xi1> to vector<128x256xi32>
      %40 = arith.sitofp %39 : vector<128x256xi32> to vector<128x256xf32>
      %41 = arith.truncf %40 : vector<128x256xf32> to vector<128x256xbf16>
      %cst = arith.constant dense<0.000000e+00> : vector<16x256xf32>
      %42 = tpu.matmul %33, %41, %cst {dimension_numbers = #tpu.dot_dimension_numbers<[1], [0], [0], [1], [0, 0, 1, 1], [], []>} : vector<16x128xbf16>, vector<128x256xbf16>, vector<16x256xf32> -> vector<16x256xf32>
      %c0_24 = arith.constant 0 : index
      %c0_25 = arith.constant 0 : index
      %c0_26 = arith.constant 0 : index
      %43 = vector.load %arg5[%c0_24, %c0_25, %c0_26] : memref<1x3x256xf32, #tpu.memory_space<vmem>>, vector<1x3x256xf32>
      %44 = vector.shape_cast %43 : vector<1x3x256xf32> to vector<3x256xf32>
      %45 = vector.extract_strided_slice %44 {offsets = [0, 0], sizes = [1, 256], strides = [1, 1]} : vector<3x256xf32> to vector<1x256xf32>
      %46 = vector.extract_strided_slice %42 {offsets = [0, 0], sizes = [3, 256], strides = [1, 1]} : vector<16x256xf32> to vector<3x256xf32>
      %47 = vector.broadcast %45 : vector<1x256xf32> to vector<3x256xf32>
      %48 = arith.mulf %47, %46 : vector<3x256xf32>
      %49 = vector.extract_strided_slice %44 {offsets = [1, 0], sizes = [1, 256], strides = [1, 1]} : vector<3x256xf32> to vector<1x256xf32>
      %50 = vector.extract_strided_slice %42 {offsets = [3, 0], sizes = [3, 256], strides = [1, 1]} : vector<16x256xf32> to vector<3x256xf32>
      %51 = vector.broadcast %49 : vector<1x256xf32> to vector<3x256xf32>
      %52 = arith.mulf %51, %50 : vector<3x256xf32>
      %53 = arith.addf %48, %52 : vector<3x256xf32>
      %54 = vector.extract_strided_slice %44 {offsets = [2, 0], sizes = [1, 256], strides = [1, 1]} : vector<3x256xf32> to vector<1x256xf32>
      %55 = vector.extract_strided_slice %42 {offsets = [6, 0], sizes = [3, 256], strides = [1, 1]} : vector<16x256xf32> to vector<3x256xf32>
      %56 = vector.broadcast %54 : vector<1x256xf32> to vector<3x256xf32>
      %57 = arith.mulf %56, %55 : vector<3x256xf32>
      %58 = arith.addf %53, %57 : vector<3x256xf32>
      %59 = vector.shape_cast %9 : vector<1x256xi1> to vector<1x256xi1>
      %60 = vector.broadcast %59 : vector<1x256xi1> to vector<3x256xi1>
      %61 = arith.select %60, %12, %58 : vector<3x256xi1>, vector<3x256xf32>
      %62 = arith.truncf %61 : vector<3x256xf32> to vector<3x256xbf16>
      %c0_27 = arith.constant 0 : index
      %c0_28 = arith.constant 0 : index
      %c0_29 = arith.constant 0 : index
      %63 = vector.load %arg8[%c0_27, %c0_28, %c0_29] : memref<1x4x256xbf16, #tpu.memory_space<vmem>>, vector<1x3x256xbf16>
      %64 = vector.shape_cast %63 : vector<1x3x256xbf16> to vector<3x256xbf16>
      %65 = vector.shape_cast %62 : vector<3x256xbf16> to vector<1x3x256xbf16>
      tpu.vector_store %arg8[%c0_27, %c0_28, %c0_29], %65 {strides = array<i32>} : memref<1x4x256xbf16, #tpu.memory_space<vmem>>, vector<1x3x256xbf16>,
      %cst_30 = arith.constant 0.000000e+00 : f32
      %cst_31 = arith.constant 1.000000e+00 : f32
      %66 = vector.broadcast %cst_30 : f32 to vector<1x256xf32>
      %67 = vector.broadcast %cst_31 : f32 to vector<1x256xf32>
      %68 = arith.select %9, %66, %67 : vector<1x256xi1>, vector<1x256xf32>
      %69 = arith.truncf %68 : vector<1x256xf32> to vector<1x256xbf16>
      %c0_32 = arith.constant 0 : index
      %c3 = arith.constant 3 : index
      %c0_33 = arith.constant 0 : index
      %70 = vector.load %arg8[%c0_32, %c3, %c0_33] : memref<1x4x256xbf16, #tpu.memory_space<vmem>>, vector<1x1x256xbf16>
      %71 = vector.shape_cast %70 : vector<1x1x256xbf16> to vector<1x256xbf16>
      %72 = vector.shape_cast %69 : vector<1x256xbf16> to vector<1x1x256xbf16>
      tpu.vector_store %arg8[%c0_32, %c3, %c0_33], %72 {strides = array<i32>} : memref<1x4x256xbf16, #tpu.memory_space<vmem>>, vector<1x1x256xbf16>,
    } else {
    }
    return
  }
  func.func @transform_0(%arg0: i32, %arg1: i32, %arg2: memref<2xi32, #tpu.memory_space<smem>>, %arg3: memref<2xi32, #tpu.memory_space<smem>>) -> (i32, i32, i32) {
    %c0_i32 = arith.constant 0 : i32
    %c0_i32_0 = arith.constant 0 : i32
    return %arg0, %c0_i32, %arg1 : i32, i32, i32
  }
  func.func @transform_1(%arg0: i32, %arg1: i32, %arg2: memref<2xi32, #tpu.memory_space<smem>>, %arg3: memref<2xi32, #tpu.memory_space<smem>>) -> (i32, i32, i32) {
    %c0_i32 = arith.constant 0 : i32
    %c0_i32_0 = arith.constant 0 : i32
    return %arg0, %c0_i32, %arg1 : i32, i32, i32
  }
  func.func @transform_3(%arg0: i32, %arg1: i32, %arg2: memref<2xi32, #tpu.memory_space<smem>>, %arg3: memref<2xi32, #tpu.memory_space<smem>>) -> (i32, i32) {
    %c0_i32 = arith.constant 0 : i32
    %c0_i32_0 = arith.constant 0 : i32
    %c0_i32_1 = arith.constant 0 : i32
    return %c0_i32, %c0_i32_0 : i32, i32
  }
  func.func @transform_4(%arg0: i32, %arg1: i32, %arg2: memref<2xi32, #tpu.memory_space<smem>>, %arg3: memref<2xi32, #tpu.memory_space<smem>>) -> (i32, i32, i32) {
    %c0_i32 = arith.constant 0 : i32
    %c0_i32_0 = arith.constant 0 : i32
    return %arg0, %c0_i32, %arg1 : i32, i32, i32
  }
}

</mosaic_0001>

<bundles_post_ra>
// kernel: tpu_custom_call.1
= control target key start
LH: loop header
LB: loop body
LE: loop exit
PB: predicated region body
PF: predicated region fallthrough
CT: control target
= control target key end

     0   :  { %s1367_s0 = inlined_call_operand.vmem [shape: s32[2], index: 0, kind: input, shape index: {}]   ;;  %s1368_s2 = inlined_call_operand.vmem [shape: s32[2,1,256], index: 2, kind: input, shape index: {}]   ;;  %s1369_s3 = inlined_call_operand.vmem [shape: f32[2,3,256], index: 3, kind: input, shape index: {}]   ;;  %s1370_s4 = inlined_call_operand.vmem [shape: bf16[1,16,128], index: 4, kind: input, shape index: {}]   ;;  %s1371_s5 = inlined_call_operand.vmem [shape: f32[3,1], index: 5, kind: input, shape index: {}]   ;;  %s1372_s6 = inlined_call_operand.hbm [shape: bf16[2,4,256], index: 6, kind: output, shape index: {}]   ;;  %s1373_s1 = inlined_call_operand.vmem [shape: s32[2], index: 1, kind: input, shape index: {}]  }
   0x1   :  { %s11_s23 = sshll.u32 %s1367_s0, 4  ;;  %s15_s26 = sshll.u32 %s1373_s1, 4  ;;  %s12_s23 = int_to_ptr.vmem [resolvable:$true] %s11_s23  ;;  %s16_s26 = int_to_ptr.vmem [resolvable:$true] %s15_s26 }
   0x2   :  { %s974_s27 = scalar_lea.vmem %s12_s23, 16  ;;  %p979_p1 = scmp.lt.s32.totalorder %s12_s23, %s12_s23 }
   0x3   :  { %p975_p0 = scmp.ne.s32.totalorder %s12_s23, %s974_s27  ;;  %p980_p2 = scmp.lt.s32.totalorder %s974_s27, %s974_s27 }
   0x5   :  { %p981_p3 = por %p980_p2, %p979_p1 }
   0x7   :  { %p982_p4 = pnand %p981_p3, %p975_p0 }
   0x9   :  { %985 = shalt.err (!%p982_p4)  }
   0xa   :  { %s1080_s28 = smov [#allocation5]   ;;  %s986_s29 = scalar_lea.vmem %s16_s26, 16 }
   0xb   :  { %14 = dma.vmem_to_smem %s12_s23, 16, %s1080_s28, [#allocation4] }
   0xc   :  { %p987_p5 = scmp.ne.s32.totalorder %s16_s26, %s986_s29  ;;  %p991_p6 = scmp.lt.s32.totalorder %s16_s26, %s16_s26 }
   0xd   :  { %p992_p7 = scmp.lt.s32.totalorder %s986_s29, %s986_s29 }
   0xf   :  { %p993_p8 = por %p992_p7, %p991_p6 }
  0x11   :  { %p994_p9 = pnand %p993_p8, %p987_p5 }
  0x13   :  { %997 = shalt.err (!%p994_p9)  }
  0x14   :  { %s1081_s0 = smov [#allocation6]  }
  0x15   :  { %18 = dma.vmem_to_smem %s16_s26, 16, %s1081_s0, [#allocation4] }
  0x16   :  { %1048 = dma.done.wait [#allocation4], 32 }
  0x17   :  { %1049 = vsyncadd [#allocation4], 4294967264 }
  0x18   :  { %20 = sfence }
  0x19   :  { %21 = vsyncpa [#allocation8], 0 }
  0x1a   :  { %23 = vsyncpa [#allocation8 + $0x1], 0  ;;  %s1130_s1 = smov 0   ;;  %s1132_s30 = smov 0  }
  0x1b   :  { %s1134_s7 = smov 0   ;;  %s1136_s8 = smov 0  }
  0x1c   :  { %s1138_s9 = smov 0   ;;  %s1140_s10 = smov 0  }
  0x1d LB: > { %s822_s11 = sadd.s32 4294967295, %s1078_s10   ;;  %s823_s12 = sadd.s32 4294967294, %s1078_s10   ;;  %s1078_s10 = sphi %s1140_s10, %s29_s10   ;;  %s1074_s9 = sphi %s1138_s9, %s1382_s9   ;;  %s1070_s8 = sphi %s1136_s8, %s1381_s8   ;;  %s1066_s7 = sphi %s1134_s7, %s1380_s7   ;;  %s1062_s30 = sphi %s1132_s30, %s1379_s30   ;;  %s1058_s1 = sphi %s1130_s1, %s1378_s1  }
  0x1e   : > { %s41_s13 = sadd.s32 1, %s1074_s9  ;;  %s127_s14 = sadd.s32 1, %s1066_s7 }
  0x1f   : > { %p43_p10 = scmp.ge.s32.totalorder %s41_s13, 2  ;;  %p137_p11 = scmp.ne.s32.totalorder %s1066_s7, %s1062_s30 }
  0x20   : > { %p138_p12 = scmp.eq.s32.totalorder %s822_s11, 1  ;;  %p143_p13 = scmp.ne.s32.totalorder %s1062_s30, %s1058_s1 }
  0x21   : > { %s1384_s13 = smov (%p43_p10, %s41_s13), 0  ;;  %p144_p1 = scmp.eq.s32.totalorder %s823_s12, 1 }
  0x22   : > { %p1170_p0 = por %p138_p12, %p137_p11  ;;  %s122_s16 = ssub.s32 %s1074_s9, %s1384_s13 }
  0x23   : > { %p826_p2 = scmp.ge.s32.totalorder %s1078_s10, 1  ;;  %p125_p3 = scmp.eq.s32.totalorder %s122_s16, 0 }
  0x24   : > { %p1177_p4 = por %p144_p1, %p143_p13  ;;  %p190_p5 = scmp.lt.s32.totalorder %s1078_s10, 3 }
  0x25   : > { %s1183_s18 = scalar_select %p125_p3, %s1066_s7, %s127_s14  }
  0x26   : > { %p191_p6 = pnand %p826_p2, %p190_p5 }
  0x27   : > { %s223_s21 = sand.u32 (!%p191_p6), 1, %s1062_s30   ;;  %p227_p7 = scmp.lt.s32.totalorder (!%p191_p6), %s1070_s8, 1 }
  0x28   : > { %194 = sbr.rel (%p191_p6) target bundleno = 489 (0x1e9), region = 32  ;;  %s827_s22 = sshll.u32 (!%p191_p6), %s223_s21, 2 }
  0x29   : > { %s1193_s23 = sld [smem:[#allocation5 + %s1070_s8]] (!%p191_p6)  ;;  %s1212_s16 = scalar_lea.vmem (!%p191_p6), [#allocation7], %s827_s22 }
  0x2a   : > { %s1196_s24 = sld [smem:[#allocation6 + %s1070_s8]] (!%p191_p6) }
  0x2d   : > { %v252_v0 = vld [vmem:[%s1371_s5] sm:$0x7]  ;;  %v1082_v1 = vmov 0   ;;  %s228_s25 = scalar_select %p227_p7, %s1070_s8, 1 }
  0x2e   : > { %972 = vset.pattern.permute.xlu0 %v1082_v1 }
  0x2f   : > { %255 = vperm.xlu0 %972, %v252_v0   ;;  %s828_s26 = sshll.u32 %s228_s25, 1  ;;  %s907_s27 = sshll.u32 %s228_s25, 3 }
  0x30   : > { %s233_s0 = scalar_lea.vmem %s1368_s2, %s828_s26  ;;  %s1205_s14 = scalar_lea.vmem %s1369_s3, %s907_s27 }
  0x31   : > { %v1207_v2 = vld [vmem:[%s233_s0] sm:$0x3]  ;;  %p831_p8 = scmp.ge.s32.totalorder %s1196_s24, %s1193_s23 }
  0xa6   : > { %261 = sbr.rel (%p831_p8) target bundleno = 191 (0xbf), region = 36 }
  0xaa   : > { %v1210_v3 = vpop.permute.xlu0 %255 }
  0xab   : > { %v267_v4 = vlaneseq  ;;  %vm272_vm1 = vcmask 1041408   ;;  %v1083_v5 = vmov 269488144   ;;  %vm273_vm2 = vsmask.f32 1280 }
  0xac   : > { %v265_v6 = vunpack.c.l.s4 %v1083_v5  ;;  %vm275_vm3 = vcmask 1043458   ;;  %vm276_vm4 = vsmask.f32 3328  ;;  %vm274_vm5 = vmand %vm272_vm1, %vm273_vm2  ;;  %v262_v8 = vpack.c.bf16 %v1210_v3, %v1210_v3  ;;  %v279_v11 = vld [vmem:[%s1212_s16] sm:$0xf] }
  0xad   : > { %v268_v7 = vshrl.u32 %v267_v4, 7  ;;  %vm277_vm6 = vmand %vm275_vm3, %vm276_vm4  ;;  %vm282_vm8 = vcmask 1041409   ;;  %vm283_vm9 = vsmask.f32 7942  ;;  %vm285_vm10 = vcmask 1043459  }
  0xae   : > { %v266_v9 = vunpack.c.0.s8 %v265_v6  ;;  %vm278_vm7 = vmor %vm277_vm6, %vm274_vm5  ;;  %vm286_vm11 = vsmask.f32 7950 }
  0xaf   : > { %vm284_vm12 = vmand %vm282_vm8, %vm283_vm9 }
  0xb0   : > { %v269_v10 = vsub.s32 %v266_v9, %v268_v7  ;;  %vm287_vm13 = vmand %vm285_vm10, %vm286_vm11 }
  0xb1   : > { %vm288_vm14 = vmor %vm287_vm13, %vm284_vm12 }
  0xb2   : > { %v270_v12 = vrot.slane %v262_v8, %v269_v10 }
  0xb4   : > { %v280_v13 = vsel %vm278_vm7, %v270_v12, %v279_v11 }
  0xb5   : > { %281 = vst [vmem:[%s1212_s16] sm:$0xf] %v280_v13 }
  0xbc   : > { %v289_v14 = vld [vmem:[%s1212_s16] sm:$0xa] }
  0xbd   : > { %v290_v15 = vsel %vm288_vm14, 0, %v289_v14 }
  0xbe   : > { %291 = vst [vmem:[%s1212_s16] sm:$0xa] %v290_v15 }
  0xbf PF: > { %p832_p9 = scmp.lt.s32.totalorder %s1196_s24, %s1193_s23 }
  0xc1   : > { %295 = sbr.rel (%p832_p9) target bundleno = 466 (0x1d2), region = 40 }
  0xc6   : > { %v296_v16 = vlaneseq  ;;  %v346_v17 = vld [vmem:[%s1370_s4] sm:$0xff] }
  0xc7   : > { %347 = vst [vmem:[#allocation2] sm:$0xff] %v346_v17 }
  0xc8   : > { %v1227_v18 = vshrl.u32 %v296_v16, 7 }
  0xca   : > { %v1230_v19 = vadd.s32 8, %v1227_v18  ;;  %v1233_v20 = vadd.s32 16, %v1227_v18  ;;  %v1236_v21 = vadd.s32 24, %v1227_v18  ;;  %v1239_v22 = vadd.s32 32, %v1227_v18 }
  0xcb   : > { %v1242_v23 = vadd.s32 40, %v1227_v18  ;;  %v303_v24 = vadd.s32 48, %v1227_v18  ;;  %v304_v25 = vadd.s32 56, %v1227_v18  ;;  %v305_v26 = vadd.s32 64, %v1227_v18 }
  0xcc   : > { %v306_v27 = vadd.s32 72, %v1227_v18  ;;  %v307_v28 = vadd.s32 80, %v1227_v18  ;;  %v308_v29 = vadd.s32 88, %v1227_v18  ;;  %v309_v30 = vadd.s32 96, %v1227_v18 }
  0xcd   : > { %v310_v31 = vadd.s32 104, %v1227_v18  ;;  %v311_v32 = vadd.s32 112, %v1227_v18  ;;  %v312_v33 = vadd.s32 120, %v1227_v18 }
  0xce   : > { %355 = vsyncadd [#allocation3], 128  ;;  %v1255_v34 = vsub.s32 1, %v1227_v18  ;;  %v1258_v35 = vsub.s32 0, %v1227_v18 }
  0xcf   : > { %1050 = dma.done.wait [#allocation3], 128 }
  0xd0   : > { %1051 = vsyncadd [#allocation3], 4294967168  ;;  %v369_v36 = vrot.slane %v1207_v2, %v1255_v34  ;;  %v1264_v37 = vrot.slane %v1207_v2, %v1258_v35  ;;  %v1084_v38 = vmov 0   ;;  %v1085_v39 = vmov 1.0|1.0   ;;  %v973_v40 = vld [vmem:[#allocation2] sm:$0xff]  }
  0xd1   : > { %520 = vmatprep.mubr.bf16.mxu0 %v1084_v38  ;;  %v531_v41 = vld [vmem:[%s1205_s14] sm:$0x77]  ;;  %v559_v42 = vsub.s32 5, %v1227_v18  ;;  %v583_v43 = vsub.s32 2, %v1227_v18  ;;  %v587_v45 = vsub.s32 6, %v1227_v18  ;;  %v539_v48 = vsub.s32 4, %v1227_v18 }
  0xd2   : > { %vm399_vm15 = vcmp.eq.s32.totalorder %v311_v32, %v369_v36  ;;  %vm401_vm1 = vcmp.eq.s32.totalorder %v312_v33, %v369_v36  ;;  %vm398_vm2 = vcmp.eq.s32.totalorder %v311_v32, %v1264_v37  ;;  %vm400_vm3 = vcmp.eq.s32.totalorder %v312_v33, %v1264_v37 }
  0xd3   : > { %vm866_vm4 = vmpackc.low %vm401_vm1, %vm399_vm15  ;;  %vm395_vm5 = vcmp.eq.s32.totalorder %v309_v30, %v369_v36  ;;  %vm397_vm6 = vcmp.eq.s32.totalorder %v310_v31, %v369_v36  ;;  %vm394_vm7 = vcmp.eq.s32.totalorder %v309_v30, %v1264_v37  ;;  %vm396_vm8 = vcmp.eq.s32.totalorder %v310_v31, %v1264_v37 }
  0xd4   : > { %867 = vmatprep.subr.msk.bf16.mxu0 %vm866_vm4, %v1085_v39  ;;  %vm868_vm9 = vmpackc.low %vm400_vm3, %vm398_vm2  ;;  %vm391_vm10 = vcmp.eq.s32.totalorder %v307_v28, %v369_v36  ;;  %vm393_vm11 = vcmp.eq.s32.totalorder %v308_v29, %v369_v36  ;;  %vm390_vm0 = vcmp.eq.s32.totalorder %v307_v28, %v1264_v37  ;;  %vm392_vm15 = vcmp.eq.s32.totalorder %v308_v29, %v1264_v37 }
  0xd5   : > { %869 = vmatpush1.bf16.msk.msra.mxu0 %vm868_vm9, %v1085_v39  ;;  %vm870_vm12 = vmpackc.low %vm397_vm6, %vm395_vm5  ;;  %vm387_vm1 = vcmp.eq.s32.totalorder %v305_v26, %v369_v36  ;;  %vm389_vm4 = vcmp.eq.s32.totalorder %v306_v27, %v369_v36  ;;  %vm386_vm9 = vcmp.eq.s32.totalorder %v305_v26, %v1264_v37  ;;  %vm388_vm5 = vcmp.eq.s32.totalorder %v306_v27, %v1264_v37 }
  0xd6   : > { %871 = vmatprep.subr.msk.bf16.mxu0 %vm870_vm12, %v1085_v39  ;;  %vm872_vm13 = vmpackc.low %vm396_vm8, %vm394_vm7  ;;  %vm383_vm6 = vcmp.eq.s32.totalorder %v303_v24, %v369_v36  ;;  %vm385_vm12 = vcmp.eq.s32.totalorder %v304_v25, %v369_v36  ;;  %v556_v44 = vrot.slane %v531_v41, %v1255_v34  ;;  %v560_v46 = vrot.slane %v531_v41, %v559_v42 }
  0xd7   : > { %vm874_vm14 = vmpackc.low %vm393_vm11, %vm391_vm10  ;;  %vm382_vm10 = vcmp.eq.s32.totalorder %v303_v24, %v1264_v37  ;;  %vm384_vm11 = vcmp.eq.s32.totalorder %v304_v25, %v1264_v37  ;;  %v584_v47 = vrot.slane %v531_v41, %v583_v43  ;;  %v588_v50 = vrot.slane %v531_v41, %v587_v45 }
  0xd8   : > { %vm876_vm2 = vmpackc.low %vm392_vm15, %vm390_vm0  ;;  %v566_v49 = vrot.slane %v556_v44, %v1255_v34  ;;  %v536_v51 = vrot.slane %v531_v41, %v1258_v35  ;;  %v570_v52 = vrot.slane %v560_v46, %v1255_v34  ;;  %v540_v55 = vrot.slane %v531_v41, %v539_v48 }
  0xd9   : > { %873 = vmatpush1.bf16.msk.msra.mxu0 %vm872_vm13, %v1085_v39  ;;  %vm878_vm3 = vmpackc.low %vm389_vm4, %vm387_vm1  ;;  %vm379_vm13 = vcmp.eq.s32.totalorder %v1239_v22, %v369_v36  ;;  %vm378_vm1 = vcmp.eq.s32.totalorder %v1239_v22, %v1264_v37  ;;  %vm380_vm4 = vcmp.eq.s32.totalorder %v1242_v23, %v1264_v37  ;;  %v594_v53 = vrot.slane %v584_v47, %v583_v43 }
  0xda   : > { %875 = vmatprep.subr.msk.bf16.mxu0 %vm874_vm14, %v1085_v39  ;;  %vm880_vm7 = vmpackc.low %vm388_vm5, %vm386_vm9  ;;  %vm381_vm14 = vcmp.eq.s32.totalorder %v1242_v23, %v369_v36  ;;  %v598_v58 = vrot.slane %v588_v50, %v583_v43  ;;  %v546_v59 = vrot.slane %v536_v51, %v1258_v35  ;;  %v550_v1 = vrot.slane %v540_v55, %v1258_v35 }
  0xdb   : > { %vm882_vm8 = vmpackc.low %vm385_vm12, %vm383_vm6  ;;  %vm374_vm6 = vcmp.eq.s32.totalorder %v1233_v20, %v1264_v37  ;;  %vm376_vm12 = vcmp.eq.s32.totalorder %v1236_v21, %v1264_v37  ;;  %v1086_v7 = vmov 1983009808   ;;  %v1087_v9 = vmov 1.0  }
  0xdc   : > { %vm884_vm0 = vmpackc.low %vm384_vm11, %vm382_vm10  ;;  %v637_v8 = vunpack.c.l.s4 %v1086_v7 }
  0xdd   : > { %877 = vmatpush1.bf16.msk.msra.mxu0 %vm876_vm2, %v1085_v39  ;;  %vm886_vm15 = vmpackc.low %vm381_vm14, %vm379_vm13  ;;  %vm375_vm2 = vcmp.eq.s32.totalorder %v1233_v20, %v369_v36  ;;  %vm370_vm13 = vcmp.eq.s32.totalorder %v1227_v18, %v1264_v37  ;;  %vm372_vm14 = vcmp.eq.s32.totalorder %v1230_v19, %v1264_v37 }
  0xde   : > { %879 = vmatprep.subr.msk.bf16.mxu0 %vm878_vm3, %v1085_v39  ;;  %vm377_vm3 = vcmp.eq.s32.totalorder %v1236_v21, %v369_v36  ;;  %vm888_vm9 = vmpackc.low %vm380_vm4, %vm378_vm1  ;;  %vm607_vm4 = vcmask 1041408   ;;  %v638_v25 = vunpack.c.0.s8 %v637_v8 }
  0xdf   : > { %vm890_vm5 = vmpackc.low %vm377_vm3, %vm375_vm2  ;;  %vm645_vm2 = vsmask.f32 1280  ;;  %vm647_vm3 = vcmask 1043458  }
  0xe0   : > { %vm892_vm10 = vmpackc.low %vm376_vm12, %vm374_vm6  ;;  %v641_v31 = vsub.s32 %v638_v25, %v1227_v18 }
  0xe1   : > { %881 = vmatpush1.bf16.msk.msra.mxu0 %vm880_vm7, %v1085_v39  ;;  %vm371_vm7 = vcmp.eq.s32.totalorder %v1227_v18, %v369_v36  ;;  %vm646_vm12 = vmand %vm607_vm4, %vm645_vm2 }
  0xe2   : > { %883 = vmatprep.subr.msk.bf16.mxu0 %vm882_vm8, %v1085_v39  ;;  %vm373_vm8 = vcmp.eq.s32.totalorder %v1230_v19, %v369_v36 }
  0xe3   : > { %vm894_vm11 = vmpackc.low %vm373_vm8, %vm371_vm7 }
  0xe5   : > { %885 = vmatpush1.bf16.msk.msra.mxu0 %vm884_vm0, %v1085_v39  ;;  %vm896_vm0 = vmpackc.low %vm372_vm14, %vm370_vm13  ;;  %vm686_vm13 = vcmask 1043459   ;;  %vm687_vm14 = vsmask.f32 7950 }
  0xe6   : > { %887 = vmatprep.subr.msk.bf16.mxu0 %vm886_vm15, %v1085_v39  ;;  %vm1376_vm15 = vcmp.lt.s32.totalorder %v1207_v2, 0 }
  0xe7   : > { %v618_v56 = vsel %vm1376_vm15, 1, %v1084_v38  ;;  %vm1377_vm1 = vmmov %vm1376_vm15 }
  0xe8   : > { %v622_v63 = vrot.slane %v618_v56, %v1258_v35  ;;  %v654_v10 = vsel %vm1377_vm1, 0.0, %v1087_v9  ;;  %v626_v11 = vrot.slane %v618_v56, %v1255_v34  ;;  %vm688_vm15 = vmand %vm686_vm13, %vm687_vm14 }
  0xe9   : > { %889 = vmatpush1.bf16.msk.msra.mxu0 %vm888_vm9, %v1085_v39  ;;  %v659_v21 = vrot.slane %v654_v10, %v1258_v35  ;;  %v663_v22 = vrot.slane %v654_v10, %v1255_v34  ;;  %vm648_vm9 = vsmask.f32 3328  ;;  %v651_v35 = vld [vmem:[%s1212_s16] sm:$0xf] }
  0xea   : > { %891 = vmatprep.subr.msk.bf16.mxu0 %vm890_vm5, %v1085_v39  ;;  %vm627_vm5 = vcmp.eq.s32.totalorder %v622_v63, 1  ;;  %vm628_vm6 = vcmp.eq.s32.totalorder %v626_v11, 1  ;;  %vm649_vm7 = vmand %vm647_vm3, %vm648_vm9 }
  0xeb   : > { %v899_v30 = vpack.c.bf16 %v663_v22, %v659_v21  ;;  %vm650_vm8 = vmor %vm649_vm7, %vm646_vm12 }
  0xed   : > { %893 = vmatpush1.bf16.msk.msra.mxu0 %vm892_vm10, %v1085_v39  ;;  %v677_v36 = vrot.slane %v899_v30, %v641_v31  ;;  %vm683_vm10 = vcmask 1041409  }
  0xee   : > { %895 = vmatprep.subr.msk.bf16.mxu0 %vm894_vm11, %v1085_v39  ;;  %vm684_vm11 = vsmask.f32 7942 }
  0xf1   : > { %897 = vmatpush1.bf16.msk.msra.mxu0 %vm896_vm0, %v1085_v39  ;;  %v679_v39 = vshll.u32 %v677_v36, 16  ;;  %vm685_vm0 = vmand %vm683_vm10, %vm684_vm11 }
  0xf2   : > { %vm689_vm1 = vmor %vm688_vm15, %vm685_vm0 }
  0xf3   : > { %v681_v18 = vrot.slane %v679_v39, 7 }
  0xf4   : > { %521 = vmatmul.mubr.bf16.vlgmr.msra.gmra.mxu0 %v973_v40 }
 0x1b4   : > { %v522_v54 = vpop.f32.mrf.mxu0 }
 0x1b5   : > { %v571_v57 = vmul.f32 %v566_v49, %v522_v54  ;;  %v599_v62 = vmul.f32 %v594_v53, %v522_v54  ;;  %v551_v12 = vmul.f32 %v546_v59, %v522_v54 }
 0x1b6   : > { %v524_v60 = vpop.f32.mrf.mxu0 }
 0x1b7   : > { %v572_v61 = vmul.f32 %v570_v52, %v524_v60  ;;  %v575_v0 = vrot.slane %v571_v57, 3  ;;  %v600_v6 = vmul.f32 %v598_v58, %v524_v60  ;;  %v608_v15 = vrot.slane %v599_v62, 6 }
 0x1b8   : > { %v526_v4 = vpop.f32.mrf.mxu0  ;;  %v552_v20 = vmul.f32 %v550_v1, %v524_v60 }
 0x1b9   : > { %v601_v5 = vmul.f32 %v594_v53, %v526_v4  ;;  %v576_v13 = vrot.slane %v572_v61, 3  ;;  %v579_v19 = vadd.f32 %v575_v0, %v551_v12  ;;  %v611_v2 = vrot.slane %v600_v6, 6 }
 0x1ba   : > { %v528_v14 = vpop.f32.mrf.mxu0 }
 0x1bb   : > { %v609_v16 = vrot.slane %v601_v5, 6  ;;  %v602_v17 = vmul.f32 %v598_v58, %v528_v14  ;;  %v580_v26 = vadd.f32 %v576_v13, %v552_v20 }
 0x1bd   : > { %v610_v23 = vsel %vm607_vm4, %v608_v15, %v609_v16  ;;  %v612_v24 = vrot.slane %v602_v17, 6 }
 0x1be   : > { %v616_v27 = vadd.f32 %v610_v23, %v579_v19 }
 0x1bf   : > { %v613_v28 = vsel %vm607_vm4, %v611_v2, %v612_v24 }
 0x1c0   : > { %v617_v29 = vadd.f32 %v613_v28, %v580_v26  ;;  %v629_v32 = vsel %vm627_vm5, %v1210_v3, %v616_v27 }
 0x1c2   : > { %v630_v33 = vsel %vm628_vm6, %v1210_v3, %v617_v29 }
 0x1c3   : > { %v898_v34 = vpack.c.bf16 %v630_v33, %v629_v32 }
 0x1c5   : > { %v642_v37 = vrot.slane %v898_v34, %v641_v31 }
 0x1c7   : > { %v652_v38 = vsel %vm650_vm8, %v642_v37, %v651_v35 }
 0x1c8   : > { %653 = vst [vmem:[%s1212_s16] sm:$0xf] %v652_v38 }
 0x1cf   : > { %v690_v40 = vld [vmem:[%s1212_s16] sm:$0xa] }
 0x1d0   : > { %v691_v3 = vsel %vm689_vm1, %v681_v18, %v690_v40 }
 0x1d1   : > { %692 = vst [vmem:[%s1212_s16] sm:$0xa] %v691_v3 }
 0x1d2 PF: > { %s908_s22 = sshll.u32 %s1070_s8, 6  ;;  %s710_s26 = sshll.u32 %s1212_s16, 4  ;;  %s711_s26 = int_to_ptr.vmem [resolvable:$true] %s710_s26 }
 0x1d3   : > { %s708_s25 = scalar_lea.hbm %s1372_s6, %s908_s22  ;;  %s694_s27 = scalar_lea.sflag [#allocation8], %s223_s21 }
 0x1d4   : > { %s998_s28 = scalar_lea.vmem %s711_s26, 64  ;;  %s1088_s29 = smov [#allocation7]  }
 0x1d5   : > { %p999_p10 = scmp.ne.s32.totalorder %s711_s26, %s998_s28  ;;  %s1002_s0 = sshll.u32 %s1088_s29, 4  ;;  %s1003_s0 = int_to_ptr.vmem [resolvable:$false] %s1002_s0 }
 0x1d6   : > { %s1004_s11 = scalar_lea.vmem %s1003_s0, 128  ;;  %p1005_p13 = scmp.lt.s32.totalorder %s711_s26, %s1003_s0 }
 0x1d7   : > { %p1000_p11 = pnand %p999_p10, %p1170_p0  ;;  %p1006_p1 = scmp.lt.s32.totalorder %s1004_s11, %s998_s28 }
 0x1d9   : > { %p1001_p12 = pneg %p1000_p11  ;;  %p1007_p2 = por %p1006_p1, %p1005_p13 }
 0x1db   : > { %p1008_p3 = pnand %p1007_p2, %p1001_p12 }
 0x1dd   : > { %1011 = shalt.err (!%p1008_p3)
}
 0x1de   : > { %s1012_s8 = scalar_lea.hbm %s708_s25, 64  ;;  %s1016_s14 = scalar_lea.hbm %s1372_s6, 128 }
 0x1df   : > { %p1013_p5 = scmp.ne.s32.totalorder %s708_s25, %s1012_s8  ;;  %p1017_p8 = scmp.lt.s32.totalorder %s708_s25, %s1372_s6 }
 0x1e0   : > { %p1018_p9 = scmp.lt.s32.totalorder %s1016_s14, %s1012_s8 }
 0x1e1   : > { %p1014_p6 = pnand %p1013_p5, %p1170_p0 }
 0x1e2   : > { %p1019_p10 = por %p1018_p9, %p1017_p8 }
 0x1e3   : > { %p1015_p7 = pneg %p1014_p6 }
 0x1e5   : > { %p1020_p11 = pnand %p1019_p10, %p1015_p7 }
 0x1e7   : > { %1023 = shalt.err (!%p1020_p11)
}
 0x1e8   : > { %909 = dma.vmem_to_hbm [thread:$0]  (%p1170_p0), %s711_s26, 64, %s708_s25, %s694_s27  }
 0x1e9 PF: > { %p915_p12 = scmp.ge.s32.totalorder %s1078_s10, 2  ;;  %s722_s20 = sand.u32 1, %s1058_s1  }
 0x1ea   : > { %s723_s22 = scalar_lea.sflag [#allocation8], %s722_s20 }
 0x1eb   : > { %p912_p13 = pnand %p915_p12, %p1177_p4 }
 0x1ed   : > { %p913_p1 = pneg %p912_p13 }
 0x1ef   : > { %1053 = dma.done.wait (%p913_p1), %s723_s22, 64  }
 0x1f0   : > { %1055 = vsyncadd (%p913_p1), %s723_s22, 4294967232  ;;  %s29_s10 = sadd.s32 1, %s1078_s10   ;;  %s1378_s1 = smov %s1062_s30 }
 0x1f1   : > { %p26_p2 = scmp.ge.s32.totalorder %s29_s10, 4   ;;  %s1379_s30 = smov %s1066_s7 }
 0x1f2   : > { %s1380_s7 = smov %s1183_s18  ;;  %s1381_s8 = smov %s1074_s9 }
 0x1f3   : > { %s1382_s9 = smov %s1384_s13  ;;  %28 = sbr.rel (!%p26_p2) target bundleno = 29 (0x1d), region = 121 }
 0x1f8   :  { %728 = vsyncpa [#allocation8], 1 }
 0x1f9   :  { %730 = vsyncpa [#allocation8 + $0x1], 1 }
 0x1fa   :  { %731 = vsyncmov [#allocation3] }
 0x1fd   :  { %s732_s15 = vpop.sfrf %731 }
 0x1fe   :  { %p905_p0 = scmp.ne.s32.totalorder %s732_s15, 0 }
 0x200   :  { %736 = shalt.err (%p905_p0)  }
 0x201   :  { %738 = vsyncmov [#allocation3 + $0x1] }
 0x204   :  { %s739_s17 = vpop.sfrf %738 }
 0x205   :  { %p906_p4 = scmp.ne.s32.totalorder %s739_s17, 0 }
 0x207   :  { %743 = shalt.err (%p906_p4)  }

</bundles_post_ra>
